<compile_context>
chip_gen: v6e
topology: v6e:2x2x1
jax: 0.10.0
libtpu: 0.0.40
codegen_flags: <defaults>
</compile_context>

<pallas_src>
import jax
import jax.numpy as jnp
from jax.experimental import pallas as pl
from jax.experimental.pallas import tpu as pltpu

_TILE_BYTES = 2 * 1024 * 1024          # per-array, per-pipeline-buffer budget
_VMEM_LIMIT_BYTES = 48 * 1024 * 1024   # < v7x physical (64 MiB), raises v5e default


# --------------------------------------------------------------- kernels ----
def _attn_decoder_kernel(el_ref, x_ref, o_ref):
    """Whole-sequence block (Bt, L, tD).  El block may carry size-1 broadcast
    dims; jnp broadcasting expands it on-chip."""
    xf = x_ref[...].astype(jnp.float32)
    elf = el_ref[...].astype(jnp.float32)
    pxpl = jax.nn.sigmoid(xf) * jax.nn.sigmoid(elf)          # broadcasts to x block
    denom = jnp.sum(pxpl, axis=-2, keepdims=True)            # f32 seq reduction
    o_ref[...] = ((pxpl / denom) * xf).astype(o_ref.dtype)   # exact division


def _attn_decoder_seq_kernel(el_ref, x_ref, o_ref, denom_ref):
    """Seq-tiled two-pass variant for long L.  grid = (b, d, pass, l):
    pass 0 accumulates the f32 denominator into VMEM scratch; pass 1 re-reads
    the tiles, normalizes and writes lane-dense output blocks."""
    p = pl.program_id(2)
    l = pl.program_id(3)

    @pl.when((p == 0) & (l == 0))
    def _():
        denom_ref[...] = jnp.zeros_like(denom_ref)

    xf = x_ref[...].astype(jnp.float32)
    elf = el_ref[...].astype(jnp.float32)
    pxpl = jax.nn.sigmoid(xf) * jax.nn.sigmoid(elf)

    @pl.when(p == 0)
    def _():
        denom_ref[...] = denom_ref[...] + jnp.sum(pxpl, axis=-2, keepdims=True)

    @pl.when(p == 1)
    def _():
        o_ref[...] = ((pxpl / denom_ref[...]) * xf).astype(o_ref.dtype)


# --------------------------------------------------------------- helpers ----
def _largest_divisor_leq(n, cap):
    cap = max(1, min(n, cap))
    while n % cap:
        cap -= 1
    return cap


def _pick_lane_tile(D, rows, itemsize, budget):
    """Largest multiple of 128 dividing D whose (rows, tD) block fits the byte
    budget; D itself when D % 128 != 0 (the only other legal choice)."""
    if D % 128 != 0:
        return D
    n128 = D // 128
    for m in range(n128, 0, -1):
        if n128 % m == 0 and rows * (128 * m) * itemsize <= budget:
            return 128 * m
    return 128


def _pick_seq_tile(L, tD, itemsize, budget):
    """Largest multiple-of-8 divisor of L (strictly < L) fitting the budget;
    None when L cannot be seq-tiled legally."""
    if L % 8 != 0 or L <= 8:
        return None
    best = 8
    for tL in range(8, L, 8):
        if L % tL == 0 and tL * tD * itemsize <= budget:
            best = tL
    return best


def _ensure_multistep(B, D, Bt, tD):
    """Best effort: give the 'parallel' grid >= 2 steps so v7x's two
    TensorCores both get work, without breaking lane density."""
    if (B // Bt) * (D // tD) >= 2:
        return Bt, tD
    if tD % 256 == 0:
        return Bt, tD // 2
    if Bt > 1:
        for cand in range(Bt - 1, 0, -1):
            if B % cand == 0:
                return cand, tD
    return Bt, tD


def _el_spec(el_dims, bt, lt, dt, seq_grid):
    """BlockSpec for El without materializing its broadcast: broadcast axes get
    block dim 1 and a constant-0 index_map entry."""
    eB, eL, eD = el_dims
    block = (bt if eB != 1 else 1, lt if eL != 1 else 1, dt if eD != 1 else 1)
    if seq_grid:
        idx = lambda b, d, p, l: ((b if eB != 1 else 0),
                                  (l if eL != 1 else 0),
                                  (d if eD != 1 else 0))
    else:
        idx = lambda b, d: ((b if eB != 1 else 0), 0, (d if eD != 1 else 0))
    return pl.BlockSpec(block, idx)


# --------------------------------------------------------------- wrapper ----
def attention_decoder(El, X, *, tile_bytes=_TILE_BYTES,
                      vmem_limit_bytes=_VMEM_LIMIT_BYTES):
    """Pallas equivalent of Attentiondecoder.forward(El, X).

    X: (batch, seq, hidden).  El broadcasts against X (torch semantics)."""
    if X.ndim != 3:
        raise ValueError("X must be (batch, seq, hidden)")
    B, L, D = X.shape

    if El.ndim > 3:
        raise ValueError("El rank must not exceed X rank")
    el_dims = (1,) * (3 - El.ndim) + tuple(El.shape)
    for e, x in zip(el_dims, X.shape):
        if e not in (1, x):
            raise ValueError(f"El shape {El.shape} does not broadcast to {X.shape}")
    El3 = El.reshape(el_dims)                      # free reshape, no broadcast in HBM

    out_dtype = jnp.result_type(X.dtype, El.dtype)
    itemsize = jnp.dtype(X.dtype).itemsize
    budget = int(tile_bytes)

    tD = _pick_lane_tile(D, L, itemsize, budget)
    per_batch_bytes = L * tD * itemsize

    cp2 = pltpu.CompilerParams(
        dimension_semantics=("parallel", "parallel"),
        vmem_limit_bytes=vmem_limit_bytes)
    cp4 = pltpu.CompilerParams(
        dimension_semantics=("parallel", "parallel", "arbitrary", "arbitrary"),
        vmem_limit_bytes=vmem_limit_bytes)

    if per_batch_bytes <= budget or (tL := _pick_seq_tile(L, tD, itemsize, budget)) is None:
        # ---- single-pass path: whole sequence resident per block -----------
        Bt = _largest_divisor_leq(B, max(1, budget // max(1, per_batch_bytes)))
        Bt, tD = _ensure_multistep(B, D, Bt, tD)
        block = (Bt, L, tD)
        idx = lambda b, d: (b, 0, d)
        return pl.pallas_call(
            _attn_decoder_kernel,
            out_shape=jax.ShapeDtypeStruct((B, L, D), out_dtype),
            grid_spec=pltpu.PrefetchScalarGridSpec(
                num_scalar_prefetch=0,
                grid=(B // Bt, D // tD),
                in_specs=[_el_spec(el_dims, Bt, L, tD, seq_grid=False),
                          pl.BlockSpec(block, idx)],
                out_specs=pl.BlockSpec(block, idx),
            ),
            compiler_params=cp2,
        )(El3, X)

    # ---- two-pass seq-tiled path (long L) ----------------------------------
    n_l = L // tL
    block = (1, tL, tD)
    x_idx = lambda b, d, p, l: (b, l, d)
    # Pass 0 pins the output block index to (b, 0, d) so no unwritten buffer
    # is ever flushed; pass 1 walks the L tiles and writes them.
    o_idx = lambda b, d, p, l: (b, p * l, d)
    return pl.pallas_call(
        _attn_decoder_seq_kernel,
        out_shape=jax.ShapeDtypeStruct((B, L, D), out_dtype),
        grid_spec=pltpu.PrefetchScalarGridSpec(
            num_scalar_prefetch=0,
            grid=(B, D // tD, 2, n_l),
            in_specs=[_el_spec(el_dims, 1, tL, tD, seq_grid=True),
                      pl.BlockSpec(block, x_idx)],
            out_specs=pl.BlockSpec(block, o_idx),
            scratch_shapes=[pltpu.VMEM((1, 1, tD), jnp.float32)],
        ),
        compiler_params=cp4,
    )(El3, X)


# ------------------------------------------------------------- reference ----
def _reference(El, X):
    px = jax.nn.sigmoid(X)
    pL = jax.nn.sigmoid(El)
    pxpl = px * pL
    attn = pxpl / jnp.sum(pxpl, axis=-2, keepdims=True)
    return attn * X


if __name__ == "__main__":
    # Attentiondecoder has no learnable parameters (args/config unused).
    key = jax.random.PRNGKey(0)
    k1, k2, k3, k4, k5, k6, k7 = jax.random.split(key, 7)

    # 1) Small hidden dim (D < 128): full-D lane tile, masked stores.
    X1 = jax.random.normal(k1, (2, 8, 32), dtype=jnp.float32)
    El1 = jax.random.normal(k2, (2, 8, 32), dtype=jnp.float32)
    o1 = jax.block_until_ready(attention_decoder(El1, X1))
    assert o1.shape == X1.shape
    assert jnp.allclose(o1, _reference(El1, X1), atol=1e-3, rtol=1e-3), \
        "mismatch vs reference (small-D path)"

    # 2) Wide hidden dim: lane-dense tD (multiple of 128), >=2 grid steps.
    X2 = jax.random.normal(k3, (2, 16, 256), dtype=jnp.float32)
    El2 = jax.random.normal(k4, (2, 16, 256), dtype=jnp.float32)
    o2 = jax.block_until_ready(attention_decoder(El2, X2))
    assert o2.shape == X2.shape
    assert jnp.allclose(o2, _reference(El2, X2), atol=1e-3, rtol=1e-3), \
        "mismatch vs reference (wide-D path)"

    # 3) Broadcast El (no HBM materialization of the broadcast).
    El3b = jax.random.normal(k5, (2, 16, 1), dtype=jnp.float32)
    o3 = jax.block_until_ready(attention_decoder(El3b, X2))
    assert o3.shape == X2.shape
    assert jnp.allclose(o3, _reference(El3b, X2), atol=1e-3, rtol=1e-3), \
        "mismatch vs reference (broadcast-El path)"

    # 4) Force the long-L two-pass seq-tiled fallback with a tiny tile budget.
    X4 = jax.random.normal(k6, (1, 16, 256), dtype=jnp.float32)
    El4 = jax.random.normal(k7, (1, 16, 256), dtype=jnp.float32)
    o4 = jax.block_until_ready(attention_decoder(El4, X4, tile_bytes=4096))
    assert o4.shape == X4.shape
    assert jnp.allclose(o4, _reference(El4, X4), atol=1e-3, rtol=1e-3), \
        "mismatch vs reference (seq-tiled path)"

    print("KERNEL_OK")
</pallas_src>

<mosaic_0001>
module attributes {stable_mosaic.version = 11 : i64} {
  func.func @_attn_decoder_kernel(%arg0: i32, %arg1: i32, %arg2: memref<1x8x32xf32, #tpu.memory_space<vmem>>, %arg3: memref<1x8x32xf32, #tpu.memory_space<vmem>>, %arg4: memref<1x8x32xf32, #tpu.memory_space<vmem>>) attributes {dimension_semantics = [#tpu.dimension_semantics<parallel>, #tpu.dimension_semantics<parallel>], iteration_bounds = array<i64: 2, 1>, scalar_prefetch = 0 : i64, scratch_operands = 0 : i64, tpu.core_type = #tpu.core_type<tc>, window_params = [{transform_indices = @transform_0, window_bounds = array<i64: 1, 8, 32>}, {transform_indices = @transform_1, window_bounds = array<i64: 1, 8, 32>}, {transform_indices = @transform_2, window_bounds = array<i64: 1, 8, 32>}]} {
    %c0 = arith.constant 0 : index
    %c0_0 = arith.constant 0 : index
    %c0_1 = arith.constant 0 : index
    %0 = vector.load %arg3[%c0, %c0_0, %c0_1] : memref<1x8x32xf32, #tpu.memory_space<vmem>>, vector<1x8x32xf32>
    %c0_2 = arith.constant 0 : index
    %c0_3 = arith.constant 0 : index
    %c0_4 = arith.constant 0 : index
    %1 = vector.load %arg2[%c0_2, %c0_3, %c0_4] : memref<1x8x32xf32, #tpu.memory_space<vmem>>, vector<1x8x32xf32>
    %2 = arith.negf %0 : vector<1x8x32xf32>
    %3 = math.exp %2 : vector<1x8x32xf32>
    %cst = arith.constant 1.000000e+00 : f32
    %4 = vector.broadcast %cst : f32 to vector<1x8x32xf32>
    %5 = arith.addf %4, %3 : vector<1x8x32xf32>
    %6 = arith.divf %4, %5 : vector<1x8x32xf32>
    %7 = arith.negf %1 : vector<1x8x32xf32>
    %8 = math.exp %7 : vector<1x8x32xf32>
    %cst_5 = arith.constant 1.000000e+00 : f32
    %9 = vector.broadcast %cst_5 : f32 to vector<1x8x32xf32>
    %10 = arith.addf %9, %8 : vector<1x8x32xf32>
    %11 = arith.divf %9, %10 : vector<1x8x32xf32>
    %12 = arith.mulf %6, %11 : vector<1x8x32xf32>
    %cst_6 = arith.constant dense<0.000000e+00> : vector<1x32xf32>
    %13 = vector.multi_reduction <add>, %12, %cst_6 [1] : vector<1x8x32xf32> to vector<1x32xf32>
    %14 = vector.shape_cast %13 : vector<1x32xf32> to vector<1x1x32xf32>
    %15 = vector.broadcast %14 : vector<1x1x32xf32> to vector<1x8x32xf32>
    %16 = arith.divf %12, %15 : vector<1x8x32xf32>
    %17 = arith.mulf %16, %0 : vector<1x8x32xf32>
    %c0_7 = arith.constant 0 : index
    %c0_8 = arith.constant 0 : index
    %c0_9 = arith.constant 0 : index
    %18 = vector.load %arg4[%c0_7, %c0_8, %c0_9] : memref<1x8x32xf32, #tpu.memory_space<vmem>>, vector<1x8x32xf32>
    tpu.vector_store %arg4[%c0_7, %c0_8, %c0_9], %17 {strides = array<i32>} : memref<1x8x32xf32, #tpu.memory_space<vmem>>, vector<1x8x32xf32>,
    return
  }
  func.func @transform_0(%arg0: i32, %arg1: i32) -> (i32, i32, i32) {
    %c0_i32 = arith.constant 0 : i32
    %c0_i32_0 = arith.constant 0 : i32
    return %arg0, %c0_i32, %arg1 : i32, i32, i32
  }
  func.func @transform_1(%arg0: i32, %arg1: i32) -> (i32, i32, i32) {
    %c0_i32 = arith.constant 0 : i32
    %c0_i32_0 = arith.constant 0 : i32
    return %arg0, %c0_i32, %arg1 : i32, i32, i32
  }
  func.func @transform_2(%arg0: i32, %arg1: i32) -> (i32, i32, i32) {
    %c0_i32 = arith.constant 0 : i32
    %c0_i32_0 = arith.constant 0 : i32
    return %arg0, %c0_i32, %arg1 : i32, i32, i32
  }
}

</mosaic_0001>

<bundles_post_ra>
// kernel: tpu_custom_call.1
= control target key start
LH: loop header
LB: loop body
LE: loop exit
PB: predicated region body
PF: predicated region fallthrough
CT: control target
= control target key end

     0   :  { %7 = vsyncpa [#allocation3], 0  ;;  %s785_s0 = inlined_call_operand.hbm [shape: f32[2,8,32], index: 0, kind: input, shape index: {}]   ;;  %s786_s1 = inlined_call_operand.hbm [shape: f32[2,8,32], index: 1, kind: input, shape index: {}]   ;;  %s787_s2 = inlined_call_operand.hbm [shape: f32[2,8,32], index: 2, kind: output, shape index: {}]  }
   0x1   :  { %9 = vsyncpa [#allocation3 + $0x1], 0 }
   0x2   :  { %10 = vsyncpa [#allocation6], 0 }
   0x3   :  { %12 = vsyncpa [#allocation6 + $0x1], 0 }
   0x4   :  { %13 = vsyncpa [#allocation4], 0 }
   0x5   :  { %15 = vsyncpa [#allocation4 + $0x1], 0  ;;  %s617_s9 = smov 0   ;;  %s619_s10 = smov 0  }
   0x6   :  { %s621_s11 = smov 0   ;;  %s623_s12 = smov 0  }
   0x7   :  { %s625_s13 = smov 0   ;;  %s627_s14 = smov 0  }
   0x8 LB: > { %s362_s15 = sadd.s32 4294967295, %s597_s14   ;;  %s363_s16 = sadd.s32 4294967294, %s597_s14   ;;  %s597_s14 = sphi %s627_s14, %s21_s14   ;;  %s593_s13 = sphi %s625_s13, %s799_s13   ;;  %s589_s12 = sphi %s623_s12, %s798_s12   ;;  %s585_s11 = sphi %s621_s11, %s797_s11   ;;  %s581_s10 = sphi %s619_s10, %s796_s10   ;;  %s577_s9 = sphi %s617_s9, %s795_s9  }
   0x9   : > { %s33_s17 = sadd.s32 1, %s593_s13  ;;  %s42_s18 = sadd.s32 1, %s585_s11 }
   0xa   : > { %p35_p0 = scmp.ge.s32.totalorder %s33_s17, 2  ;;  %p49_p1 = scmp.ne.s32.totalorder %s585_s11, %s581_s10 }
   0xb   : > { %p50_p2 = scmp.eq.s32.totalorder %s597_s14, 0  ;;  %p55_p3 = scmp.ne.s32.totalorder %s581_s10, %s577_s9 }
   0xc   : > { %s801_s17 = smov (%p35_p0, %s33_s17), 0  ;;  %p56_p5 = scmp.eq.s32.totalorder %s362_s15, 0 }
   0xd   : > { %p658_p4 = por %p50_p2, %p49_p1  ;;  %s37_s20 = ssub.s32 %s593_s13, %s801_s17 }
   0xe   : > { %p109_p6 = scmp.eq.s32.totalorder %s362_s15, 1  ;;  %p40_p7 = scmp.eq.s32.totalorder %s37_s20, 0 }
   0xf   : > { %p664_p8 = por %p56_p5, %p55_p3  ;;  %p115_p10 = scmp.eq.s32.totalorder %s363_s16, 1 }
  0x10   : > { %p668_p9 = por %p109_p6, %p49_p1  ;;  %p397_p13 = scmp.lt.s32.totalorder %s597_s14, 2 }
  0x11   : > { %s673_s23 = scalar_select %p40_p7, %s585_s11, %s42_s18  }
  0x12   : > { %p675_p11 = por %p115_p10, %p55_p3  ;;  %s682_s25 = sand.u32 1, %s585_s11  }
  0x13   : > { %s366_s26 = sshll.u32 %s682_s25, 3  ;;  %s367_s27 = sshll.u32 %s593_s13, 7 }
  0x14   : > { %s145_s30 = scalar_lea.hbm %s785_s0, %s367_s27  ;;  %s139_s3 = scalar_lea.vmem [#allocation2], %s366_s26 }
  0x15   : > { %s147_s4 = sshll.u32 %s139_s3, 4  ;;  %p691_p0 = pnand %p397_p13, %p658_p4  ;;  %s148_s4 = int_to_ptr.vmem [resolvable:$true] %s147_s4 }
  0x16   : > { %p370_p1 = scmp.ge.s32.totalorder %s597_s14, 1  ;;  %p171_p2 = scmp.lt.s32.totalorder %s597_s14, 3 }
  0x17   : > { %s136_s6 = scalar_lea.sflag [#allocation3], %s682_s25  ;;  %p459_p3 = pneg %p691_p0 }
  0x18   : > { %s470_s7 = scalar_lea.vmem %s148_s4, 128  ;;  %s599_s8 = smov [#allocation2]  }
  0x19   : > { %p471_p5 = scmp.ne.s32.totalorder %s148_s4, %s470_s7  ;;  %s475_s15 = sshll.u32 %s599_s8, 4  ;;  %s476_s15 = int_to_ptr.vmem [resolvable:$false] %s475_s15 }
  0x1a   : > { %s477_s16 = scalar_lea.vmem %s476_s15, 256  ;;  %p478_p4 = scmp.lt.s32.totalorder %s148_s4, %s476_s15 }
  0x1b   : > { %p473_p6 = pnand %p471_p5, %p459_p3  ;;  %p479_p10 = scmp.lt.s32.totalorder %s477_s16, %s470_s7 }
  0x1d   : > { %p474_p7 = pneg %p473_p6  ;;  %p480_p13 = por %p479_p10, %p478_p4 }
  0x1f   : > { %p481_p12 = pnand %p480_p13, %p474_p7 }
  0x21   : > { %484 = shalt.err (!%p481_p12)
}
  0x22   : > { %389 = dma.hbm_to_vmem [thread:$0]  (!%p691_p0), %s145_s30, 128, %s148_s4, %s136_s6  }
  0x23   : > { %p709_p5 = pnand %p370_p1, %p171_p2  ;;  %s164_s28 = scalar_lea.hbm %s786_s1, %s367_s27 }
  0x24   : > { %s158_s29 = scalar_lea.vmem [#allocation5], %s366_s26  ;;  %s155_s7 = scalar_lea.sflag [#allocation6], %s682_s25 }
  0x25   : > { %s166_s3 = sshll.u32 %s158_s29, 4  ;;  %s600_s30 = smov [#allocation5]   ;;  %s167_s3 = int_to_ptr.vmem [resolvable:$true] %s166_s3 }
  0x26   : > { %s498_s8 = scalar_lea.vmem %s167_s3, 128  ;;  %s503_s4 = sshll.u32 %s600_s30, 4  ;;  %s504_s4 = int_to_ptr.vmem [resolvable:$false] %s503_s4 }
  0x27   : > { %p499_p12 = scmp.ne.s32.totalorder %s167_s3, %s498_s8  ;;  %s505_s6 = scalar_lea.vmem %s504_s4, 256 }
  0x28   : > { %p506_p1 = scmp.lt.s32.totalorder %s167_s3, %s504_s4  ;;  %p507_p2 = scmp.lt.s32.totalorder %s505_s6, %s498_s8 }
  0x29   : > { %p501_p6 = pnand %p499_p12, %p459_p3 }
  0x2a   : > { %p508_p4 = por %p507_p2, %p506_p1 }
  0x2b   : > { %p502_p7 = pneg %p501_p6 }
  0x2d   : > { %p509_p10 = pnand %p508_p4, %p502_p7 }
  0x2f   : > { %512 = shalt.err (!%p509_p10)
}
  0x30   : > { %392 = dma.hbm_to_vmem [thread:$0]  (!%p691_p0), %s164_s28, 128, %s167_s3, %s155_s7  }
  0x31   : > { %175 = sbr.rel (%p709_p5) target bundleno = 137 (0x89), region = 28  ;;  %s725_s25 = sand.u32 (!%p709_p5), 1, %s581_s10  }
  0x32   : > { %s728_s26 = sshll.u32 (!%p709_p5), %s725_s25, 3  ;;  %s178_s27 = scalar_lea.sflag (!%p709_p5), [#allocation3], %s725_s25 }
  0x33   : > { %s181_s15 = scalar_lea.vmem (!%p709_p5), [#allocation2], %s728_s26 }
  0x36   : > { %564 = dma.done.wait (%p664_p8), %s178_s27, 128  }
  0x37   : > { %566 = vsyncadd (%p664_p8), %s178_s27, 4294967168  ;;  %s187_s5 = scalar_lea.sflag [#allocation6], %s725_s25  ;;  %s190_s16 = scalar_lea.vmem [#allocation5], %s728_s26 }
  0x38   : > { %568 = dma.done.wait (%p664_p8), %s187_s5, 128  }
  0x39   : > { %570 = vsyncadd (%p664_p8), %s187_s5, 4294967168  ;;  %v216_v0 = vld [vmem:[%s190_s16] sm:$0xff]  ;;  %v217_v1 = vld [vmem:[%s181_s15] sm:$0xff]  ;;  %vm231_vm0 = vcmask 261120   ;;  %s215_s21 = scalar_lea.vmem [#allocation7], %s728_s26  ;;  %s377_s19 = sshll.u32 %s589_s12, 7 }
  0x3a   : > { %v374_v2 = vmul.f32 -1.442695, %v216_v0  ;;  %v375_v3 = vmul.f32 -1.442695, %v217_v1  ;;  %s258_s18 = sshll.u32 %s215_s21, 4  ;;  %s256_s29 = scalar_lea.hbm %s787_s2, %s377_s19  ;;  %s259_s18 = int_to_ptr.vmem [resolvable:$true] %s258_s18 }
  0x3b   : > { %s244_s3 = scalar_lea.sflag [#allocation4], %s725_s25  ;;  %s513_s7 = scalar_lea.vmem %s259_s18, 128 }
  0x3c   : > { %447 = vpow2.f32 %v374_v2  ;;  %p514_p8 = scmp.ne.s32.totalorder %s259_s18, %s513_s7  ;;  %s601_s8 = smov [#allocation7]  }
  0x3d   : > { %449 = vpow2.f32 %v375_v3  ;;  %s517_s30 = sshll.u32 %s601_s8, 4  ;;  %s518_s30 = int_to_ptr.vmem [resolvable:$false] %s517_s30 }
  0x3e   : > { %p515_p0 = pnand %p514_p8, %p668_p9  ;;  %s519_s4 = scalar_lea.vmem %s518_s30, 256 }
  0x3f   : > { %p520_p13 = scmp.lt.s32.totalorder %s259_s18, %s518_s30  ;;  %p521_p5 = scmp.lt.s32.totalorder %s519_s4, %s513_s7 }
  0x40   : > { %p516_p3 = pneg %p515_p0 }
  0x41   : > { %p522_p12 = por %p521_p5, %p520_p13 }
  0x43   : > { %p523_p6 = pnand %p522_p12, %p516_p3 }
  0x49   : > { %v448_v4 = vpop.eup %447 }
  0x4a   : > { %v450_v5 = vpop.eup %449  ;;  %v221_v6 = vadd.f32 1.0, %v448_v4 }
  0x4b   : > { %v227_v7 = vadd.f32 1.0, %v450_v5 }
  0x4c   : > { %451 = vrcp.f32 %v221_v6 }
  0x4d   : > { %453 = vrcp.f32 %v227_v7 }
  0x59   : > { %v452_v8 = vpop.eup %451 }
  0x5a   : > { %v454_v9 = vpop.eup %453 }
  0x5b   : > { %v230_v10 = vmul.f32 %v454_v9, %v452_v8 }
  0x5d   : > { %v232_v11 = vsel %vm231_vm0, %v230_v10, 0.0 }
  0x5e   : > { %v233_v12 = vrot.slane %v232_v11, 4 }
  0x60   : > { %v234_v13 = vadd.f32 %v233_v12, %v232_v11 }
  0x62   : > { %v235_v14 = vrot.slane %v234_v13, 2 }
  0x64   : > { %v236_v15 = vadd.f32 %v235_v14, %v234_v13 }
  0x66   : > { %v237_v16 = vrot.slane %v236_v15, 1 }
  0x68   : > { %v238_v17 = vadd.f32 %v237_v16, %v236_v15 }
  0x6a   : > { %455 = vrcp.f32 %v238_v17 }
  0x77   : > { %v456_v18 = vpop.eup %455 }
  0x78   : > { %v240_v19 = vmul.f32 %v456_v18, %v230_v10 }
  0x7a   : > { %v241_v20 = vmul.f32 %v240_v19, %v216_v0 }
  0x7c   : > { %242 = vst.msk [vmem:[%s215_s21] sm:$0xff] %vm231_vm0, %v241_v20 }
  0x7d   : > { %526 = shalt.err (!%p523_p6)
}
  0x7e   : > { %s527_s12 = scalar_lea.hbm %s256_s29, 128  ;;  %s531_s26 = scalar_lea.hbm %s787_s2, 256 }
  0x7f   : > { %p528_p7 = scmp.ne.s32.totalorder %s256_s29, %s527_s12  ;;  %p532_p4 = scmp.lt.s32.totalorder %s256_s29, %s787_s2 }
  0x80   : > { %p533_p10 = scmp.lt.s32.totalorder %s531_s26, %s527_s12 }
  0x81   : > { %p529_p1 = pnand %p528_p7, %p668_p9 }
  0x82   : > { %p534_p8 = por %p533_p10, %p532_p4 }
  0x83   : > { %p530_p2 = pneg %p529_p1 }
  0x85   : > { %p535_p0 = pnand %p534_p8, %p530_p2 }
  0x87   : > { %538 = shalt.err (!%p535_p0)
}
  0x88   : > { %384 = dma.vmem_to_hbm [thread:$0]  (%p668_p9), %s259_s18, 128, %s256_s29, %s244_s3  }
  0x89 PF: > { %s270_s5 = sand.u32 1, %s577_s9   ;;  %p794_p3 = scmp.ge.s32.totalorder %s597_s14, 2 }
  0x8a   : > { %s271_s16 = scalar_lea.sflag [#allocation4], %s270_s5 }
  0x8b   : > { %p394_p13 = pnand %p794_p3, %p675_p11 }
  0x8d   : > { %p395_p5 = pneg %p394_p13 }
  0x8f   : > { %572 = dma.done.wait (%p395_p5), %s271_s16, 128  }
  0x90   : > { %574 = vsyncadd (%p395_p5), %s271_s16, 4294967168  ;;  %s21_s14 = sadd.s32 1, %s597_s14   ;;  %s795_s9 = smov %s581_s10 }
  0x91   : > { %p18_p12 = scmp.ge.s32.totalorder %s21_s14, 4   ;;  %s796_s10 = smov %s585_s11 }
  0x92   : > { %s797_s11 = smov %s673_s23  ;;  %s798_s12 = smov %s593_s13 }
  0x93   : > { %s799_s13 = smov %s801_s17  ;;  %20 = sbr.rel (!%p18_p12) target bundleno = 8 (0x8), region = 86 }
  0x98   :  { %276 = vsyncpa [#allocation3], 1 }
  0x99   :  { %278 = vsyncpa [#allocation3 + $0x1], 1 }
  0x9a   :  { %279 = vsyncpa [#allocation6], 1 }
  0x9b   :  { %281 = vsyncpa [#allocation6 + $0x1], 1 }
  0x9c   :  { %282 = vsyncpa [#allocation4], 1 }
  0x9d   :  { %284 = vsyncpa [#allocation4 + $0x1], 1 }

</bundles_post_ra>
